<compile_context>
chip_gen: v6e
topology: v6e:2x2x1
jax: 0.10.0
libtpu: 0.0.40
codegen_flags: <defaults>
</compile_context>

<pallas_src>
import jax
import jax.numpy as jnp
from jax.experimental import pallas as pl
from jax.experimental.pallas import tpu as pltpu


# ----------------------------------------------------------------------------
# Bilinear interpolation matrices (torchvision F.resize semantics).
# ----------------------------------------------------------------------------
def _resize_matrix(out_size: int, in_size: int) -> jnp.ndarray:
    """Row-stochastic bilinear matrix, align_corners=False, antialias=False.
    (antialias only differs when downsampling; this module upsamples img_b)."""
    scale = in_size / out_size
    dst = jnp.arange(out_size, dtype=jnp.float32)
    src = jnp.maximum((dst + 0.5) * scale - 0.5, 0.0)
    i0 = jnp.minimum(jnp.floor(src).astype(jnp.int32), in_size - 1)
    i1 = jnp.minimum(i0 + 1, in_size - 1)
    lam = src - i0.astype(jnp.float32)
    m = jnp.zeros((out_size, in_size), jnp.float32)
    rows = jnp.arange(out_size)
    m = m.at[rows, i0].add(1.0 - lam)
    m = m.at[rows, i1].add(lam)
    return m


# ----------------------------------------------------------------------------
# Generation-aware hardware parameters / tiling helpers.
# ----------------------------------------------------------------------------
def _hw_params():
    """(physical VMEM bytes, TensorCores per chip), with conservative fallbacks."""
    vmem_phys = None
    try:
        vmem_phys = int(pltpu.get_tpu_info().vmem_capacity_bytes)
    except Exception:
        vmem_phys = None
    kind = ""
    try:
        kind = jax.devices()[0].device_kind.lower()
    except Exception:
        pass
    if "v5 lite" in kind or "v5e" in kind or "v5lite" in kind:
        gen_vmem, num_tc = 128 << 20, 1       # v5e: 128 MiB VMEM, 1 TC, 128-wide MXU
    elif "v6" in kind:
        gen_vmem, num_tc = 128 << 20, 1       # v6e: 128 MiB VMEM, 1 TC, 256-wide MXU
    elif "v7" in kind or "tpu7" in kind:
        gen_vmem, num_tc = 64 << 20, 2        # v7x: 64 MiB VMEM, 2 TCs, 256-wide MXU
    elif "v4" in kind or "v5" in kind:
        gen_vmem, num_tc = 128 << 20, 2       # v4 / v5p megacore
    else:
        gen_vmem, num_tc = 64 << 20, 1        # unknown: conservative
    if vmem_phys is None:
        vmem_phys = gen_vmem
    return vmem_phys, num_tc


def _vmem_limit(need_bytes: int, vmem_phys: int) -> int:
    """True need + headroom, capped per generation (3/4 of physical VMEM)."""
    limit = max(need_bytes + need_bytes // 2 + (1 << 20), 32 << 20)
    return int(min(limit, (vmem_phys * 3) // 4))


def _choose_plane_tile(nc, per_plane_bytes, const_bytes, vmem_phys, num_tc):
    """Planes per grid step -> (P, pad_rows).

    Biggest tile inside a generation-aware VMEM budget; keeps >= num_tc grid
    steps on multi-core chips (so dimension_semantics=("parallel",) can shard
    across TensorCores); prefers exact divisors of nc so no jnp.pad copies of
    the inputs are needed."""
    tile_budget = (vmem_phys * 3) // 8        # leave room for temporaries / compiler scratch
    cap = max(8, (tile_budget - const_bytes) // max(per_plane_bytes, 1))
    limit = int(min(cap, nc))
    if num_tc > 1 and nc >= 16:
        limit = min(limit, -(-nc // num_tc))  # ceil(nc/num_tc): >= num_tc parallel steps
    if limit >= nc:
        return nc, 0                          # whole batch in one block (dim == full extent)
    # Multi-step: the plane dim is second-minor for the 2-D path -> keep 8-aligned.
    # (The VMEM-derived cap is >> 256, so the MXU M dim fills the 256-wide
    #  v6e/v7x arrays without a hard-coded 128/256 cap.)
    for cand in range((limit // 8) * 8, 0, -8):
        if nc % cand == 0:
            return cand, 0
    p = max(8, (limit // 8) * 8)
    return p, (-nc) % p                       # rare fallback: pad to a multiple of P


def _const_spec(block_shape, single_buffer: bool) -> pl.BlockSpec:
    """BlockSpec for a grid-invariant operand (index_map always 0).
    Single-buffered when supported: its second pipeline buffer is VMEM waste."""
    index_map = lambda *_: (0,) * len(block_shape)
    if single_buffer:
        return pl.BlockSpec(block_shape, index_map, pipeline_mode=pl.Buffered(1))
    return pl.BlockSpec(block_shape, index_map)


# ----------------------------------------------------------------------------
# Kernels.
# ----------------------------------------------------------------------------
def _fusion_kron_kernel(k_ref, a_ref, b_ref, r_ref, o_ref):
    # k_ref: (P, 2) f32 | a_ref: (P, Ha*Wa) f32 | b_ref: (P, Hb*Wb) bf16
    # r_ref: (Hb*Wb, Ha*Wa) bf16 = kron(Rh, Rw)^T | o_ref: (P, Ha*Wa) f32
    # One MXU matmul upsamples all P planes (M = planes, N = Ha*Wa lane-dense).
    up = jnp.dot(b_ref[...], r_ref[...], preferred_element_type=jnp.float32)
    # f32 VPU epilogue (keep f32: v5e has no native bf16 VALU path).
    o_ref[...] = k_ref[:, 0:1] * a_ref[...] + k_ref[:, 1:2] * up


def _fusion_sep_kernel(k_ref, a_ref, b_ref, rwt_ref, rht_ref, o_ref):
    # k_ref: (P, 1, 2) f32 | a_ref: (P, Ha, Wa) f32 | b_ref: (P, Hb, Wb) bf16
    # rwt_ref: (Wb, Wa) bf16 = Rw^T | rht_ref: (Hb, Ha) bf16 = Rh^T
    # Separable bilinear resize as two folded 2-D MXU matmuls; the plane axis and
    # the non-contracted spatial axis are folded into M. f32 accumulation throughout.
    p, hb, wb = b_ref.shape
    wa = rwt_ref.shape[1]
    ha = rht_ref.shape[1]
    t = jnp.dot(b_ref[...].reshape(p * hb, wb), rwt_ref[...],
                preferred_element_type=jnp.float32)            # (P*Hb, Wa)
    t = jnp.swapaxes(t.reshape(p, hb, wa), 1, 2)               # (P, Wa, Hb)  (XLU transpose)
    u = jnp.dot(t.astype(rht_ref.dtype).reshape(p * wa, hb), rht_ref[...],
                preferred_element_type=jnp.float32)            # (P*Wa, Ha)
    up = jnp.swapaxes(u.reshape(p, wa, ha), 1, 2)              # (P, Ha, Wa)
    o_ref[...] = k_ref[:, :, 0:1] * a_ref[...] + k_ref[:, :, 1:2] * up


# ----------------------------------------------------------------------------
# pallas_call wrappers.
# ----------------------------------------------------------------------------
def _run_kron(k2, a2, b2, r_t, p, vmem_phys, single_buffer_consts):
    nc_pad, hwa = a2.shape
    hwb = b2.shape[1]
    r_bufs = 1 if single_buffer_consts else 2
    need = (2 * (4 * p * hwa + 2 * p * hwb + 8 * p + 4 * p * hwa)
            + r_bufs * 2 * hwb * hwa)
    return pl.pallas_call(
        _fusion_kron_kernel,
        out_shape=jax.ShapeDtypeStruct((nc_pad, hwa), jnp.float32),
        grid_spec=pltpu.PrefetchScalarGridSpec(
            num_scalar_prefetch=0,
            grid=(nc_pad // p,),
            in_specs=[
                pl.BlockSpec((p, 2), lambda i: (i, 0)),          # per-block k
                pl.BlockSpec((p, hwa), lambda i: (i, 0)),        # img_a planes (f32)
                pl.BlockSpec((p, hwb), lambda i: (i, 0)),        # img_b planes (bf16)
                _const_spec((hwb, hwa), single_buffer_consts),   # kron(Rh,Rw)^T (bf16)
            ],
            out_specs=pl.BlockSpec((p, hwa), lambda i: (i, 0)),
        ),
        compiler_params=pltpu.CompilerParams(
            dimension_semantics=("parallel",),
            vmem_limit_bytes=_vmem_limit(need, vmem_phys)),
    )(k2, a2, b2, r_t)


def _run_sep(k3, a3, b3, rwt, rht, p, vmem_phys, single_buffer_consts):
    nc_pad, ha, wa = a3.shape
    hb, wb = b3.shape[1:]
    bufs = 1 if single_buffer_consts else 2
    need = (2 * (4 * p * ha * wa + 2 * p * hb * wb + 8 * p + 4 * p * ha * wa)
            + bufs * 2 * (wb * wa + hb * ha)
            + p * (6 * hb * wa + 8 * ha * wa))                   # in-kernel temporaries
    return pl.pallas_call(
        _fusion_sep_kernel,
        out_shape=jax.ShapeDtypeStruct((nc_pad, ha, wa), jnp.float32),
        grid_spec=pltpu.PrefetchScalarGridSpec(
            num_scalar_prefetch=0,
            grid=(nc_pad // p,),
            in_specs=[
                pl.BlockSpec((p, 1, 2), lambda i: (i, 0, 0)),    # per-block k
                pl.BlockSpec((p, ha, wa), lambda i: (i, 0, 0)),  # img_a planes (f32)
                pl.BlockSpec((p, hb, wb), lambda i: (i, 0, 0)),  # img_b planes (bf16)
                _const_spec((wb, wa), single_buffer_consts),     # Rw^T (bf16)
                _const_spec((hb, ha), single_buffer_consts),     # Rh^T (bf16)
            ],
            out_specs=pl.BlockSpec((p, ha, wa), lambda i: (i, 0, 0)),
        ),
        compiler_params=pltpu.CompilerParams(
            dimension_semantics=("parallel",),
            vmem_limit_bytes=_vmem_limit(need, vmem_phys)),
    )(k3, a3, b3, rwt, rht)


# Use the kron(Rh,Rw) single-matmul path only while its bf16 operand stays tiny
# (launch-overhead-bound sizes); otherwise the separable path avoids the
# O((Ha*Wa)*(Hb*Wb)) operand and its redundant FLOPs entirely.
_KRON_R_BYTES_MAX = 2 << 20


def image_fusion_forward(img_a, img_b, k, img_d=None):
    """Pallas implementation of ImageFusionModule.forward.

    img_a: (N, C, Ha, Wa) f32, img_b: (N, C, Hb, Wb) f32, k: (C, 2) f32.
    Returns (fused, state); state mirrors the design_mat / target_vec side
    outputs when img_d is given (else None)."""
    N, C, Ha, Wa = img_a.shape
    _, _, Hb, Wb = img_b.shape
    NC, HWa, HWb = N * C, Ha * Wa, Hb * Wb

    rh = _resize_matrix(Ha, Hb)                     # (Ha, Hb)  (weights exact in bf16 for pow2 ratios)
    rw = _resize_matrix(Wa, Wb)                     # (Wa, Wb)

    vmem_phys, num_tc = _hw_params()
    use_kron = (HWb * HWa * 2) <= _KRON_R_BYTES_MAX
    k_nc = jnp.tile(k.astype(jnp.float32), (N, 1))  # (NC, 2) per-plane coefficients

    if use_kron:
        per_plane = 2 * (4 * HWa + 2 * HWb + 8 + 4 * HWa)
        const_bytes = 2 * 2 * HWb * HWa             # sized for worst case (double-buffered R)
        P, pad = _choose_plane_tile(NC, per_plane, const_bytes, vmem_phys, num_tc)
        a2 = img_a.reshape(NC, HWa).astype(jnp.float32)
        b2 = img_b.reshape(NC, HWb).astype(jnp.bfloat16)   # bf16 MXU operand, f32 accumulate
        k2 = k_nc
        if pad:
            # TODO(synk): a masked tail store would avoid this extra HBM copy;
            # _choose_plane_tile picks a divisor of NC whenever one exists.
            a2 = jnp.pad(a2, ((0, pad), (0, 0)))
            b2 = jnp.pad(b2, ((0, pad), (0, 0)))
            k2 = jnp.pad(k2, ((0, pad), (0, 0)))
        r_t = jnp.kron(rh, rw).T.astype(jnp.bfloat16)      # (Hb*Wb, Ha*Wa), Rw^T pre-folded
        try:
            fused_flat = _run_kron(k2, a2, b2, r_t, P, vmem_phys, True)
        except Exception:
            # pipeline_mode=pl.Buffered(1) unsupported -> default double buffering.
            fused_flat = _run_kron(k2, a2, b2, r_t, P, vmem_phys, False)
        fused = fused_flat[:NC].reshape(N, C, Ha, Wa)
    else:
        per_plane = 2 * (4 * HWa + 2 * HWb + 8 + 4 * HWa) + (6 * Hb * Wa + 8 * HWa)
        const_bytes = 2 * 2 * (Wb * Wa + Hb * Ha)
        P, pad = _choose_plane_tile(NC, per_plane, const_bytes, vmem_phys, num_tc)
        a3 = img_a.reshape(NC, Ha, Wa).astype(jnp.float32)
        b3 = img_b.reshape(NC, Hb, Wb).astype(jnp.bfloat16)
        k3 = k_nc.reshape(NC, 1, 2)
        if pad:
            a3 = jnp.pad(a3, ((0, pad), (0, 0), (0, 0)))
            b3 = jnp.pad(b3, ((0, pad), (0, 0), (0, 0)))
            k3 = jnp.pad(k3, ((0, pad), (0, 0), (0, 0)))
        rwt = rw.T.astype(jnp.bfloat16)                    # (Wb, Wa)
        rht = rh.T.astype(jnp.bfloat16)                    # (Hb, Ha)
        try:
            fused3 = _run_sep(k3, a3, b3, rwt, rht, P, vmem_phys, True)
        except Exception:
            fused3 = _run_sep(k3, a3, b3, rwt, rht, P, vmem_phys, False)
        fused = fused3[:NC].reshape(N, C, Ha, Wa)

    state = None
    if img_d is not None:
        # Side-state only (does not affect the returned tensor). The module only
        # ever consumes the center column, so contract with rw[col] directly
        # instead of materializing the full resize.
        col = Wa // 2
        up_col = jnp.einsum("hb,ncbw,w->nch", rh, img_b.astype(jnp.float32), rw[col])
        va = jnp.transpose(img_a, (1, 0, 2, 3))[:, :, :, col][:, None]   # (C,1,N,Ha)
        vb = jnp.transpose(up_col, (1, 0, 2))[:, None]                    # (C,1,N,Ha)
        vd = jnp.transpose(img_d, (1, 0, 2, 3))[:, :, :, col][:, None]    # (C,1,N,Ha)
        state = (jnp.concatenate((va, vb), axis=1), vd)                   # ((C,2,N,Ha),(C,1,N,Ha))
        # TODO(synk): the PyTorch module stores design_mat/target_vec as module
        # state consumed later by fit(); here they are returned functionally.
    return fused, state


def _reference_forward(img_a, img_b, k):
    """Plain-JAX f32 reference for verification."""
    rh = _resize_matrix(img_a.shape[2], img_b.shape[2])
    rw = _resize_matrix(img_a.shape[3], img_b.shape[3])
    up = jnp.einsum("hb,ncbw,xw->nchx", rh, img_b, rw)
    return k[None, :, 0, None, None] * img_a + k[None, :, 1, None, None] * up


if __name__ == "__main__":
    key = jax.random.PRNGKey(0)
    ka, kb, kd, ka2, kb2 = jax.random.split(key, 5)

    N, C = 2, 3
    k_fit = jnp.full((C, 2), 0.5, jnp.float32)    # values fit() would produce
    k_zero = jnp.zeros((C, 2), jnp.float32)       # module's __init__ value (unfit)

    # --- case 1: tiny images -> single-matmul kron path ----------------------
    Ha, Wa, Hb, Wb = 16, 16, 8, 8
    img_a = jax.random.normal(ka, (N, C, Ha, Wa), dtype=jnp.float32)
    img_b = jax.random.normal(kb, (N, C, Hb, Wb), dtype=jnp.float32)
    img_d = jax.random.normal(kd, (N, C, Ha, Wa), dtype=jnp.float32)

    fused, state = image_fusion_forward(img_a, img_b, k_fit, img_d=img_d)
    fused = jax.block_until_ready(fused)
    ref = _reference_forward(img_a, img_b, k_fit)
    assert fused.shape == (N, C, Ha, Wa)
    # bf16 MXU operands -> ~1e-2 worst-case abs error vs the f32 reference.
    assert jnp.allclose(fused, ref, atol=3e-2, rtol=3e-2), "kron path mismatch"
    assert state is not None and state[0].shape == (C, 2, N, Ha)
    assert state[1].shape == (C, 1, N, Ha)

    # Unfit module (k == 0) must return all zeros, like the PyTorch reference.
    fused0, _ = image_fusion_forward(img_a, img_b, k_zero)
    assert jnp.allclose(jax.block_until_ready(fused0), 0.0, atol=1e-6)

    # --- case 2: bigger images -> separable two-matmul path ------------------
    Ha, Wa, Hb, Wb = 256, 256, 128, 128
    img_a2 = jax.random.normal(ka2, (N, C, Ha, Wa), dtype=jnp.float32)
    img_b2 = jax.random.normal(kb2, (N, C, Hb, Wb), dtype=jnp.float32)
    fused2, _ = image_fusion_forward(img_a2, img_b2, k_fit)
    fused2 = jax.block_until_ready(fused2)
    ref2 = _reference_forward(img_a2, img_b2, k_fit)
    assert fused2.shape == (N, C, Ha, Wa)
    assert jnp.allclose(fused2, ref2, atol=3e-2, rtol=3e-2), "separable path mismatch"

    print("KERNEL_OK")
</pallas_src>

<mosaic_0001>
module attributes {stable_mosaic.version = 11 : i64} {
  func.func @_fusion_kron_kernel(%arg0: i32, %arg1: memref<6x2xf32, #tpu.memory_space<vmem>>, %arg2: memref<6x256xf32, #tpu.memory_space<vmem>>, %arg3: memref<6x64xbf16, #tpu.memory_space<vmem>>, %arg4: memref<64x256xbf16, #tpu.memory_space<vmem>>, %arg5: memref<6x256xf32, #tpu.memory_space<vmem>>) attributes {dimension_semantics = [#tpu.dimension_semantics<parallel>], iteration_bounds = array<i64: 1>, scalar_prefetch = 0 : i64, scratch_operands = 0 : i64, tpu.core_type = #tpu.core_type<tc>, window_params = [{transform_indices = @transform_0, window_bounds = array<i64: 6, 2>}, {transform_indices = @transform_1, window_bounds = array<i64: 6, 256>}, {transform_indices = @transform_2, window_bounds = array<i64: 6, 64>}, {pipeline_mode = #tpu.pipeline_mode<synchronous>, transform_indices = @transform_3, window_bounds = array<i64: 64, 256>}, {transform_indices = @transform_4, window_bounds = array<i64: 6, 256>}]} {
    %c0 = arith.constant 0 : index
    %c0_0 = arith.constant 0 : index
    %0 = vector.load %arg3[%c0, %c0_0] : memref<6x64xbf16, #tpu.memory_space<vmem>>, vector<6x64xbf16>
    %c0_1 = arith.constant 0 : index
    %c0_2 = arith.constant 0 : index
    %1 = vector.load %arg4[%c0_1, %c0_2] : memref<64x256xbf16, #tpu.memory_space<vmem>>, vector<64x256xbf16>
    %cst = arith.constant dense<0.000000e+00> : vector<6x256xf32>
    %2 = tpu.matmul %0, %1, %cst {dimension_numbers = #tpu.dot_dimension_numbers<[1], [0], [0], [1], [0, 0, 1, 1], [], []>} : vector<6x64xbf16>, vector<64x256xbf16>, vector<6x256xf32> -> vector<6x256xf32>
    %c0_3 = arith.constant 0 : index
    %c0_4 = arith.constant 0 : index
    %3 = vector.load %arg1[%c0_3, %c0_4] : memref<6x2xf32, #tpu.memory_space<vmem>>, vector<6x1xf32>
    %c0_5 = arith.constant 0 : index
    %c0_6 = arith.constant 0 : index
    %4 = vector.load %arg2[%c0_5, %c0_6] : memref<6x256xf32, #tpu.memory_space<vmem>>, vector<6x256xf32>
    %5 = vector.broadcast %3 : vector<6x1xf32> to vector<6x256xf32>
    %6 = arith.mulf %5, %4 : vector<6x256xf32>
    %c0_7 = arith.constant 0 : index
    %c1 = arith.constant 1 : index
    %7 = vector.load %arg1[%c0_7, %c1] : memref<6x2xf32, #tpu.memory_space<vmem>>, vector<6x1xf32>
    %8 = vector.broadcast %7 : vector<6x1xf32> to vector<6x256xf32>
    %9 = arith.mulf %8, %2 : vector<6x256xf32>
    %10 = arith.addf %6, %9 : vector<6x256xf32>
    %c0_8 = arith.constant 0 : index
    %c0_9 = arith.constant 0 : index
    %11 = vector.load %arg5[%c0_8, %c0_9] : memref<6x256xf32, #tpu.memory_space<vmem>>, vector<6x256xf32>
    tpu.vector_store %arg5[%c0_8, %c0_9], %10 {strides = array<i32>} : memref<6x256xf32, #tpu.memory_space<vmem>>, vector<6x256xf32>,
    return
  }
  func.func @transform_0(%arg0: i32) -> (i32, i32) {
    %c0_i32 = arith.constant 0 : i32
    %c0_i32_0 = arith.constant 0 : i32
    return %arg0, %c0_i32 : i32, i32
  }
  func.func @transform_1(%arg0: i32) -> (i32, i32) {
    %c0_i32 = arith.constant 0 : i32
    %c0_i32_0 = arith.constant 0 : i32
    return %arg0, %c0_i32 : i32, i32
  }
  func.func @transform_2(%arg0: i32) -> (i32, i32) {
    %c0_i32 = arith.constant 0 : i32
    %c0_i32_0 = arith.constant 0 : i32
    return %arg0, %c0_i32 : i32, i32
  }
  func.func @transform_3(%arg0: i32) -> (i32, i32) {
    %c0_i32 = arith.constant 0 : i32
    %c0_i32_0 = arith.constant 0 : i32
    %c0_i32_1 = arith.constant 0 : i32
    return %c0_i32, %c0_i32_0 : i32, i32
  }
  func.func @transform_4(%arg0: i32) -> (i32, i32) {
    %c0_i32 = arith.constant 0 : i32
    %c0_i32_0 = arith.constant 0 : i32
    return %arg0, %c0_i32 : i32, i32
  }
}

module attributes {stable_mosaic.version = 11 : i64} {
  func.func @_fusion_kron_kernel(%arg0: i32, %arg1: memref<6x2xf32, #tpu.memory_space<vmem>>, %arg2: memref<6x256xf32, #tpu.memory_space<vmem>>, %arg3: memref<6x64xbf16, #tpu.memory_space<vmem>>, %arg4: memref<64x256xbf16, #tpu.memory_space<vmem>>, %arg5: memref<6x256xf32, #tpu.memory_space<vmem>>) attributes {dimension_semantics = [#tpu.dimension_semantics<parallel>], iteration_bounds = array<i64: 1>, scalar_prefetch = 0 : i64, scratch_operands = 0 : i64, tpu.core_type = #tpu.core_type<tc>, window_params = [{transform_indices = @transform_0, window_bounds = array<i64: 6, 2>}, {transform_indices = @transform_1, window_bounds = array<i64: 6, 256>}, {transform_indices = @transform_2, window_bounds = array<i64: 6, 64>}, {pipeline_mode = #tpu.pipeline_mode<synchronous>, transform_indices = @transform_3, window_bounds = array<i64: 64, 256>}, {transform_indices = @transform_4, window_bounds = array<i64: 6, 256>}]} {
    %c0 = arith.constant 0 : index
    %c0_0 = arith.constant 0 : index
    %0 = vector.load %arg3[%c0, %c0_0] : memref<6x64xbf16, #tpu.memory_space<vmem>>, vector<6x64xbf16>
    %c0_1 = arith.constant 0 : index
    %c0_2 = arith.constant 0 : index
    %1 = vector.load %arg4[%c0_1, %c0_2] : memref<64x256xbf16, #tpu.memory_space<vmem>>, vector<64x256xbf16>
    %cst = arith.constant dense<0.000000e+00> : vector<6x256xf32>
    %2 = tpu.matmul %0, %1, %cst {dimension_numbers = #tpu.dot_dimension_numbers<[1], [0], [0], [1], [0, 0, 1, 1], [], []>} : vector<6x64xbf16>, vector<64x256xbf16>, vector<6x256xf32> -> vector<6x256xf32>
    %c0_3 = arith.constant 0 : index
    %c0_4 = arith.constant 0 : index
    %3 = vector.load %arg1[%c0_3, %c0_4] : memref<6x2xf32, #tpu.memory_space<vmem>>, vector<6x1xf32>
    %c0_5 = arith.constant 0 : index
    %c0_6 = arith.constant 0 : index
    %4 = vector.load %arg2[%c0_5, %c0_6] : memref<6x256xf32, #tpu.memory_space<vmem>>, vector<6x256xf32>
    %5 = vector.broadcast %3 : vector<6x1xf32> to vector<6x256xf32>
    %6 = arith.mulf %5, %4 : vector<6x256xf32>
    %c0_7 = arith.constant 0 : index
    %c1 = arith.constant 1 : index
    %7 = vector.load %arg1[%c0_7, %c1] : memref<6x2xf32, #tpu.memory_space<vmem>>, vector<6x1xf32>
    %8 = vector.broadcast %7 : vector<6x1xf32> to vector<6x256xf32>
    %9 = arith.mulf %8, %2 : vector<6x256xf32>
    %10 = arith.addf %6, %9 : vector<6x256xf32>
    %c0_8 = arith.constant 0 : index
    %c0_9 = arith.constant 0 : index
    %11 = vector.load %arg5[%c0_8, %c0_9] : memref<6x256xf32, #tpu.memory_space<vmem>>, vector<6x256xf32>
    tpu.vector_store %arg5[%c0_8, %c0_9], %10 {strides = array<i32>} : memref<6x256xf32, #tpu.memory_space<vmem>>, vector<6x256xf32>,
    return
  }
  func.func @transform_0(%arg0: i32) -> (i32, i32) {
    %c0_i32 = arith.constant 0 : i32
    %c0_i32_0 = arith.constant 0 : i32
    return %arg0, %c0_i32 : i32, i32
  }
  func.func @transform_1(%arg0: i32) -> (i32, i32) {
    %c0_i32 = arith.constant 0 : i32
    %c0_i32_0 = arith.constant 0 : i32
    return %arg0, %c0_i32 : i32, i32
  }
  func.func @transform_2(%arg0: i32) -> (i32, i32) {
    %c0_i32 = arith.constant 0 : i32
    %c0_i32_0 = arith.constant 0 : i32
    return %arg0, %c0_i32 : i32, i32
  }
  func.func @transform_3(%arg0: i32) -> (i32, i32) {
    %c0_i32 = arith.constant 0 : i32
    %c0_i32_0 = arith.constant 0 : i32
    %c0_i32_1 = arith.constant 0 : i32
    return %c0_i32, %c0_i32_0 : i32, i32
  }
  func.func @transform_4(%arg0: i32) -> (i32, i32) {
    %c0_i32 = arith.constant 0 : i32
    %c0_i32_0 = arith.constant 0 : i32
    return %arg0, %c0_i32 : i32, i32
  }
}

</mosaic_0001>

<bundles_post_ra>
// kernel: tpu_custom_call.1
= control target key start
LH: loop header
LB: loop body
LE: loop exit
PB: predicated region body
PF: predicated region fallthrough
CT: control target
= control target key end

     0   :  { %9 = vsyncpa [#allocation3], 0  ;;  %s318_s0 = inlined_call_operand.vmem [shape: f32[6,2], index: 0, kind: input, shape index: {}]   ;;  %s319_s1 = inlined_call_operand.hbm [shape: f32[6,256], index: 1, kind: input, shape index: {}]   ;;  %s320_s2 = inlined_call_operand.vmem [shape: bf16[6,64], index: 2, kind: input, shape index: {}]   ;;  %s321_s3 = inlined_call_operand.hbm [shape: bf16[64,256], index: 3, kind: input, shape index: {}]   ;;  %s322_s4 = inlined_call_operand.hbm [shape: f32[6,256], index: 4, kind: output, shape index: {}]  }
   0x1   :  { %10 = vsyncpa [#allocation6], 0 }
   0x2   :  { %11 = vsyncpa [#allocation4], 0  ;;  %s271_s15 = smov [#allocation2]   ;;  %s272_s17 = smov [#allocation5]  }
   0x3   :  { %s20_s16 = sshll.u32 %s271_s15, 4  ;;  %s31_s18 = sshll.u32 %s272_s17, 4  ;;  %s21_s16 = int_to_ptr.vmem [resolvable:$true] %s20_s16  ;;  %s32_s18 = int_to_ptr.vmem [resolvable:$true] %s31_s18 }
   0x4   :  { %s213_s19 = scalar_lea.vmem %s21_s16, 256  ;;  %p218_p1 = scmp.lt.s32.totalorder %s21_s16, %s21_s16 }
   0x5   :  { %p214_p0 = scmp.ne.s32.totalorder %s21_s16, %s213_s19  ;;  %p219_p2 = scmp.lt.s32.totalorder %s213_s19, %s213_s19 }
   0x7   :  { %p220_p3 = por %p219_p2, %p218_p1 }
   0x9   :  { %p221_p4 = pnand %p220_p3, %p214_p0 }
   0xb   :  { %224 = shalt.err (!%p221_p4)
}
   0xc   :  { %23 = dma.hbm_to_vmem [thread:$0]  %s319_s1, 256, %s21_s16, [#allocation3]  }
   0xd   :  { %s233_s22 = scalar_lea.vmem %s32_s18, 1024  ;;  %p238_p6 = scmp.lt.s32.totalorder %s32_s18, %s32_s18 }
   0xe   :  { %p234_p5 = scmp.ne.s32.totalorder %s32_s18, %s233_s22  ;;  %p239_p7 = scmp.lt.s32.totalorder %s233_s22, %s233_s22 }
  0x10   :  { %p240_p8 = por %p239_p7, %p238_p6 }
  0x12   :  { %p241_p9 = pnand %p240_p8, %p234_p5 }
  0x14   :  { %244 = shalt.err (!%p241_p9)
}
  0x15   :  { %s273_s23 = smov 128   ;;  %s274_s24 = smov 8  }
  0x16   :  { %37 = dma.hbm_to_vmem [thread:$0]  %s321_s3, 1024, %s32_s18, [#allocation6], %s273_s23, %s273_s23, %s274_s24  }
  0x17   :  { %265 = dma.done.wait [#allocation3], 256  }
  0x18   :  { %266 = vsyncadd [#allocation3], 4294967040 }
  0x19   :  { %267 = dma.done.wait [#allocation6], 1024  }
  0x1a   :  { %268 = vsyncadd [#allocation6], 4294966272  ;;  %v275_v0 = vmov 0   ;;  %v193_v1 = vld [vmem:[#allocation5 + $0x34] ss:$8 sps:$4 sm:$0xff]   ;;  %v276_v9 = vmov 1  }
  0x1b   :  { %130 = vmatprep.mubr.bf16.mxu0 %v275_v0  ;;  %191 = vset.pattern.permute.xlu0 %v275_v0  ;;  %v195_v2 = vld [vmem:[#allocation5 + $0x30] ss:$8 sps:$4 sm:$0xff]   ;;  %v196_v3 = vld [vmem:[#allocation5 + $0x24] ss:$8 sps:$4 sm:$0xff]   ;;  %v198_v4 = vld [vmem:[#allocation5 + $0x20] ss:$8 sps:$4 sm:$0xff]  }
  0x1c   :  { %106 = vmatprep.subr.bf16.mxu0 %v193_v1  ;;  %v199_v5 = vld [vmem:[#allocation5 + $0x14] ss:$8 sps:$4 sm:$0xff]   ;;  %v201_v7 = vld [vmem:[#allocation5 + $0x10] ss:$8 sps:$4 sm:$0xff]   ;;  %v202_v8 = vld [vmem:[#allocation5 + $0x4] ss:$8 sps:$4 sm:$0xff]  }
  0x1d   :  { %107 = vmatpush1.bf16.msra.mxu0 %v195_v2  ;;  %v139_v6 = vld [vmem:[%s318_s0] sm:$0x3f]  ;;  %v204_v10 = vld [vmem:[#allocation5] ss:$8 sps:$4 sm:$0xff]   ;;  %vm94_vm0 = vcmask 523264   ;;  %s277_s0 = smov [#allocation7]  }
  0x1e   :  { %108 = vmatprep.subr.bf16.mxu0 %v196_v3  ;;  %144 = vperm.xlu0 %191, %v139_v6   ;;  %v45_v11 = vld [vmem:[%s320_s2] sm:$0x7]  ;;  %v141_v15 = vld [vmem:[#allocation2 + $0x8] sm:$0x3f]  ;;  %s165_s29 = sshll.u32 %s277_s0, 4  ;;  %s166_s29 = int_to_ptr.vmem [resolvable:$true] %s165_s29 }
  0x1f   :  { %v140_v13 = vld [vmem:[#allocation2] sm:$0x3f]  ;;  %s245_s2 = scalar_lea.vmem %s166_s29, 256  ;;  %p250_p11 = scmp.lt.s32.totalorder %s166_s29, %s166_s29 }
  0x20   :  { %p246_p10 = scmp.ne.s32.totalorder %s166_s29, %s245_s2  ;;  %p251_p12 = scmp.lt.s32.totalorder %s245_s2, %s245_s2 }
  0x21   :  { %109 = vmatpush1.bf16.msra.mxu0 %v198_v4 }
  0x22   :  { %110 = vmatprep.subr.bf16.mxu0 %v199_v5  ;;  %192 = vset.pattern.permute.xlu0 %v276_v9  ;;  %p252_p13 = por %p251_p12, %p250_p11 }
  0x23   :  { %150 = vperm.xlu0 %192, %v139_v6  }
  0x24   :  { %p253_p0 = pnand %p252_p13, %p246_p10 }
  0x25   :  { %111 = vmatpush1.bf16.msra.mxu0 %v201_v7 }
  0x26   :  { %112 = vmatprep.subr.bf16.mxu0 %v202_v8 }
  0x29   :  { %113 = vmatpush1.bf16.msra.mxu0 %v204_v10 }
  0x2c   :  { %183 = vmatmul.mubr.msk.bf16.vlgmr.msra.gmra.mxu0 %vm94_vm0, %v45_v11 }
  0x99   :  { %v145_v12 = vpop.permute.xlu0 %144 }
  0x9a   :  { %v147_v17 = vmul.f32 %v145_v12, %v140_v13  ;;  %v148_v20 = vmul.f32 %v145_v12, %v141_v15 }
  0x9e   :  { %v151_v14 = vpop.permute.xlu0 %150 }
  0xec   :  { %v132_v16 = vpop.f32.mrf.mxu0 }
  0xed   :  { %v153_v18 = vmul.f32 %v151_v14, %v132_v16 }
  0xee   :  { %v134_v19 = vpop.f32.mrf.mxu0 }
  0xef   :  { %v155_v21 = vadd.f32 %v153_v18, %v147_v17  ;;  %v154_v22 = vmul.f32 %v151_v14, %v134_v19 }
  0xf0   :  { %v136_v23 = vpop.f32.mrf.mxu0 }
  0xf1   :  { %157 = vst [vmem:[#allocation7] sm:$0x3f] %v155_v21  ;;  %v156_v24 = vadd.f32 %v154_v22, %v148_v20 }
  0xf2   :  { %v137_v25 = vpop.f32.mrf.mxu0 }
  0xf3   :  { %158 = vst [vmem:[#allocation7 + $0x8] sm:$0x3f] %v156_v24 }
  0xf4   :  { %256 = shalt.err (!%p253_p0)
}
  0xf5   :  { %168 = dma.vmem_to_hbm [thread:$0]  %s166_s29, 256, %s322_s4, [#allocation4]  }
  0xf6   :  { %269 = dma.done.wait [#allocation4], 256  }
  0xf7   :  { %270 = vsyncadd [#allocation4], 4294967040 }
  0xf8   :  { %172 = vsyncpa [#allocation3], 1 }
  0xf9   :  { %173 = vsyncpa [#allocation6], 1 }
  0xfa   :  { %174 = vsyncpa [#allocation4], 1 }

// kernel: tpu_custom_call.1
= control target key start
LH: loop header
LB: loop body
LE: loop exit
PB: predicated region body
PF: predicated region fallthrough
CT: control target
= control target key end

     0   :  { %9 = vsyncpa [#allocation3], 0  ;;  %s318_s0 = inlined_call_operand.vmem [shape: f32[6,2], index: 0, kind: input, shape index: {}]   ;;  %s319_s1 = inlined_call_operand.hbm [shape: f32[6,256], index: 1, kind: input, shape index: {}]   ;;  %s320_s2 = inlined_call_operand.vmem [shape: bf16[6,64], index: 2, kind: input, shape index: {}]   ;;  %s321_s3 = inlined_call_operand.hbm [shape: bf16[64,256], index: 3, kind: input, shape index: {}]   ;;  %s322_s4 = inlined_call_operand.hbm [shape: f32[6,256], index: 4, kind: output, shape index: {}]  }
   0x1   :  { %10 = vsyncpa [#allocation6], 0 }
   0x2   :  { %11 = vsyncpa [#allocation4], 0  ;;  %s271_s15 = smov [#allocation2]   ;;  %s272_s17 = smov [#allocation5]  }
   0x3   :  { %s20_s16 = sshll.u32 %s271_s15, 4  ;;  %s31_s18 = sshll.u32 %s272_s17, 4  ;;  %s21_s16 = int_to_ptr.vmem [resolvable:$true] %s20_s16  ;;  %s32_s18 = int_to_ptr.vmem [resolvable:$true] %s31_s18 }
   0x4   :  { %s213_s19 = scalar_lea.vmem %s21_s16, 256  ;;  %p218_p1 = scmp.lt.s32.totalorder %s21_s16, %s21_s16 }
   0x5   :  { %p214_p0 = scmp.ne.s32.totalorder %s21_s16, %s213_s19  ;;  %p219_p2 = scmp.lt.s32.totalorder %s213_s19, %s213_s19 }
   0x7   :  { %p220_p3 = por %p219_p2, %p218_p1 }
   0x9   :  { %p221_p4 = pnand %p220_p3, %p214_p0 }
   0xb   :  { %224 = shalt.err (!%p221_p4)
}
   0xc   :  { %23 = dma.hbm_to_vmem [thread:$0]  %s319_s1, 256, %s21_s16, [#allocation3]  }
   0xd   :  { %s233_s22 = scalar_lea.vmem %s32_s18, 1024  ;;  %p238_p6 = scmp.lt.s32.totalorder %s32_s18, %s32_s18 }
   0xe   :  { %p234_p5 = scmp.ne.s32.totalorder %s32_s18, %s233_s22  ;;  %p239_p7 = scmp.lt.s32.totalorder %s233_s22, %s233_s22 }
  0x10   :  { %p240_p8 = por %p239_p7, %p238_p6 }
  0x12   :  { %p241_p9 = pnand %p240_p8, %p234_p5 }
  0x14   :  { %244 = shalt.err (!%p241_p9)
}
  0x15   :  { %s273_s23 = smov 128   ;;  %s274_s24 = smov 8  }
  0x16   :  { %37 = dma.hbm_to_vmem [thread:$0]  %s321_s3, 1024, %s32_s18, [#allocation6], %s273_s23, %s273_s23, %s274_s24  }
  0x17   :  { %265 = dma.done.wait [#allocation3], 256  }
  0x18   :  { %266 = vsyncadd [#allocation3], 4294967040 }
  0x19   :  { %267 = dma.done.wait [#allocation6], 1024  }
  0x1a   :  { %268 = vsyncadd [#allocation6], 4294966272  ;;  %v275_v0 = vmov 0   ;;  %v193_v1 = vld [vmem:[#allocation5 + $0x34] ss:$8 sps:$4 sm:$0xff]   ;;  %v276_v9 = vmov 1  }
  0x1b   :  { %130 = vmatprep.mubr.bf16.mxu0 %v275_v0  ;;  %191 = vset.pattern.permute.xlu0 %v275_v0  ;;  %v195_v2 = vld [vmem:[#allocation5 + $0x30] ss:$8 sps:$4 sm:$0xff]   ;;  %v196_v3 = vld [vmem:[#allocation5 + $0x24] ss:$8 sps:$4 sm:$0xff]   ;;  %v198_v4 = vld [vmem:[#allocation5 + $0x20] ss:$8 sps:$4 sm:$0xff]  }
  0x1c   :  { %106 = vmatprep.subr.bf16.mxu0 %v193_v1  ;;  %v199_v5 = vld [vmem:[#allocation5 + $0x14] ss:$8 sps:$4 sm:$0xff]   ;;  %v201_v7 = vld [vmem:[#allocation5 + $0x10] ss:$8 sps:$4 sm:$0xff]   ;;  %v202_v8 = vld [vmem:[#allocation5 + $0x4] ss:$8 sps:$4 sm:$0xff]  }
  0x1d   :  { %107 = vmatpush1.bf16.msra.mxu0 %v195_v2  ;;  %v139_v6 = vld [vmem:[%s318_s0] sm:$0x3f]  ;;  %v204_v10 = vld [vmem:[#allocation5] ss:$8 sps:$4 sm:$0xff]   ;;  %vm94_vm0 = vcmask 523264   ;;  %s277_s0 = smov [#allocation7]  }
  0x1e   :  { %108 = vmatprep.subr.bf16.mxu0 %v196_v3  ;;  %144 = vperm.xlu0 %191, %v139_v6   ;;  %v45_v11 = vld [vmem:[%s320_s2] sm:$0x7]  ;;  %v141_v15 = vld [vmem:[#allocation2 + $0x8] sm:$0x3f]  ;;  %s165_s29 = sshll.u32 %s277_s0, 4  ;;  %s166_s29 = int_to_ptr.vmem [resolvable:$true] %s165_s29 }
  0x1f   :  { %v140_v13 = vld [vmem:[#allocation2] sm:$0x3f]  ;;  %s245_s2 = scalar_lea.vmem %s166_s29, 256  ;;  %p250_p11 = scmp.lt.s32.totalorder %s166_s29, %s166_s29 }
  0x20   :  { %p246_p10 = scmp.ne.s32.totalorder %s166_s29, %s245_s2  ;;  %p251_p12 = scmp.lt.s32.totalorder %s245_s2, %s245_s2 }
  0x21   :  { %109 = vmatpush1.bf16.msra.mxu0 %v198_v4 }
  0x22   :  { %110 = vmatprep.subr.bf16.mxu0 %v199_v5  ;;  %192 = vset.pattern.permute.xlu0 %v276_v9  ;;  %p252_p13 = por %p251_p12, %p250_p11 }
  0x23   :  { %150 = vperm.xlu0 %192, %v139_v6  }
  0x24   :  { %p253_p0 = pnand %p252_p13, %p246_p10 }
  0x25   :  { %111 = vmatpush1.bf16.msra.mxu0 %v201_v7 }
  0x26   :  { %112 = vmatprep.subr.bf16.mxu0 %v202_v8 }
  0x29   :  { %113 = vmatpush1.bf16.msra.mxu0 %v204_v10 }
  0x2c   :  { %183 = vmatmul.mubr.msk.bf16.vlgmr.msra.gmra.mxu0 %vm94_vm0, %v45_v11 }
  0x99   :  { %v145_v12 = vpop.permute.xlu0 %144 }
  0x9a   :  { %v147_v17 = vmul.f32 %v145_v12, %v140_v13  ;;  %v148_v20 = vmul.f32 %v145_v12, %v141_v15 }
  0x9e   :  { %v151_v14 = vpop.permute.xlu0 %150 }
  0xec   :  { %v132_v16 = vpop.f32.mrf.mxu0 }
  0xed   :  { %v153_v18 = vmul.f32 %v151_v14, %v132_v16 }
  0xee   :  { %v134_v19 = vpop.f32.mrf.mxu0 }
  0xef   :  { %v155_v21 = vadd.f32 %v153_v18, %v147_v17  ;;  %v154_v22 = vmul.f32 %v151_v14, %v134_v19 }
  0xf0   :  { %v136_v23 = vpop.f32.mrf.mxu0 }
  0xf1   :  { %157 = vst [vmem:[#allocation7] sm:$0x3f] %v155_v21  ;;  %v156_v24 = vadd.f32 %v154_v22, %v148_v20 }
  0xf2   :  { %v137_v25 = vpop.f32.mrf.mxu0 }
  0xf3   :  { %158 = vst [vmem:[#allocation7 + $0x8] sm:$0x3f] %v156_v24 }
  0xf4   :  { %256 = shalt.err (!%p253_p0)
}
  0xf5   :  { %168 = dma.vmem_to_hbm [thread:$0]  %s166_s29, 256, %s322_s4, [#allocation4]  }
  0xf6   :  { %269 = dma.done.wait [#allocation4], 256  }
  0xf7   :  { %270 = vsyncadd [#allocation4], 4294967040 }
  0xf8   :  { %172 = vsyncpa [#allocation3], 1 }
  0xf9   :  { %173 = vsyncpa [#allocation6], 1 }
  0xfa   :  { %174 = vsyncpa [#allocation4], 1 }

</bundles_post_ra>
